<compile_context>
chip_gen: v7x
topology: tpu7x:2x2x1
jax: 0.10.0
libtpu: 0.0.40
codegen_flags: <defaults>
</compile_context>

<pallas_src>
import jax
import jax.numpy as jnp
from jax.experimental import pallas as pl
from jax.experimental.pallas import tpu as pltpu

NEG_HALF_INV_VAR = -0.5 / (0.001 ** 2)  # GaussianKernel(mean=1.0, std=0.001)


def _round_up(x, m):
    return m * ((x + m - 1) // m)


def _pad_to(x, shape):
    pads = [(0, t - s) for s, t in zip(x.shape, shape)]
    if any(p[1] for p in pads):
        x = jnp.pad(x, pads)  # zero pad: provably inert for this loss (see header)
    return x


def _word_overlap_kernel(s1_ref, s2_ref, out_ref, s1sum_ref, s2sum_ref, inv1_ref):
    k = pl.program_id(2)

    @pl.when(k == 0)
    def _init():
        x1 = s1_ref[...].astype(jnp.float32)                       # (BB, TL1, Dp)
        # Exact reciprocal (not approx): exp(-5e5*(c-1)^2) amplifies normalization
        # error.  Same eps placement as torch:  x / (||x|| + 1e-10).
        inv1_ref[...] = 1.0 / (
            jnp.sqrt(jnp.sum(x1 * x1, axis=2, keepdims=True)) + 1e-10)  # (BB, TL1, 1)
        s1sum_ref[...] = jnp.zeros_like(s1sum_ref)
        s2sum_ref[...] = jnp.zeros_like(s2sum_ref)

    x1n = s1_ref[...]                                               # native dtype -> MXU
    x2n = s2_ref[...]
    x2 = x2n.astype(jnp.float32)
    inv2 = 1.0 / (jnp.sqrt(jnp.sum(x2 * x2, axis=2)) + 1e-10)       # (BB, TL2)

    # Raw dot on the MXU in the input dtype (bf16 stays bf16), f32 accumulation.
    raw = jnp.einsum('bld,bkd->blk', x1n, x2n,
                     preferred_element_type=jnp.float32)            # (BB, TL1, TL2)

    # cosine = (s1/(||s1||+eps)) . (s2/(||s2||+eps))
    cosine = raw * inv1_ref[...] * inv2[:, None, :]
    diff = cosine - 1.0
    em = jnp.exp(diff * diff * NEG_HALF_INV_VAR)                    # (BB, TL1, TL2)
    # TODO(synk): if profiling shows the EUP as the binding slot on v6e/v7x, evaluate
    # only the exp argument in bf16 (keep diff and the square in f32); skipped here so
    # the same kernel also runs unchanged on v5e (no bf16 EUP/VPU).

    # Fused softmax-scale:  sum_k em * em/(S1_tot+eps)  ==  S2_tot / (S1_tot + eps)
    s1sum_ref[...] += jnp.sum(em, axis=2)                           # (BB, TL1)
    s2sum_ref[...] += jnp.sum(em * em, axis=2)                      # (BB, TL1)

    @pl.when(k == pl.num_programs(2) - 1)
    def _finalize():
        out_ref[...] = s2sum_ref[...] / (s1sum_ref[...] + 1e-10)    # max_match rows


def word_overlap_loss(s1, s2, s1_len, s2_len=None):
    """Pallas implementation of WordOverlapLoss.forward. Returns a scalar float32."""
    del s2_len  # unused in the original forward pass
    B, L1, D = s1.shape
    _, L2, D2 = s2.shape
    assert D == D2

    in_bytes = jnp.dtype(s1.dtype).itemsize

    # Batch block: full batch when small (block == full extent is always legal),
    # otherwise 8-row blocks (8 | sublane tile). Batch padding only when B > 8 and
    # not a multiple of 8 (padded rows produce zeros and are sliced before the mean).
    BB = B if B <= 8 else 8
    Bp = BB * pl.cdiv(B, BB)

    # Tile sizes: lane-dense (multiples of 128) where it matters, sized to a
    # conservative VMEM budget that also fits v7x (64 MiB physical) and v5e.
    TL1 = min(256, pl.next_power_of_2(_round_up(L1, 8)))
    TL2 = min(512, pl.next_power_of_2(_round_up(L2, 128)))
    Dp = _round_up(D, 128)

    def est(tl1, tl2):
        io = 2 * BB * (tl1 + tl2) * Dp * in_bytes    # double-buffered input blocks
        io += 2 * BB * tl1 * 4                       # double-buffered output block
        slab = 5 * BB * tl1 * tl2 * 4                # raw/cosine/diff/em/em^2 (f32)
        scr = 3 * BB * tl1 * 4
        return io + slab + scr

    budget = 32 * (1 << 20)
    while est(TL1, TL2) > budget and TL2 > 128:
        TL2 //= 2
    while est(TL1, TL2) > budget and TL1 > 128:      # keep TL1 a legal lane tile
        TL1 //= 2

    L1p = _round_up(L1, TL1)
    L2p = _round_up(L2, TL2)

    try:
        phys = pltpu.get_tpu_info().vmem_capacity_bytes
    except Exception:
        phys = 64 * (1 << 20)
    vmem_limit = int(min(max(2 * est(TL1, TL2), 32 * (1 << 20)), int(0.75 * phys)))

    s1p = _pad_to(s1, (Bp, L1p, Dp))
    s2p = _pad_to(s2, (Bp, L2p, Dp))

    grid = (Bp // BB, L1p // TL1, L2p // TL2)

    max_match = pl.pallas_call(
        _word_overlap_kernel,
        out_shape=jax.ShapeDtypeStruct((Bp, L1p), jnp.float32),
        grid_spec=pltpu.PrefetchScalarGridSpec(
            num_scalar_prefetch=0,
            grid=grid,
            in_specs=[
                pl.BlockSpec((BB, TL1, Dp), lambda g, i, k: (g, i, 0)),
                pl.BlockSpec((BB, TL2, Dp), lambda g, i, k: (g, k, 0)),
            ],
            out_specs=pl.BlockSpec((BB, TL1), lambda g, i, k: (g, i)),
            scratch_shapes=[
                pltpu.VMEM((BB, TL1), jnp.float32),      # S1 = sum_k em
                pltpu.VMEM((BB, TL1), jnp.float32),      # S2 = sum_k em^2
                pltpu.VMEM((BB, TL1, 1), jnp.float32),   # 1/(||s1||+eps) cache
            ],
        ),
        compiler_params=pltpu.CompilerParams(
            dimension_semantics=("parallel", "parallel", "arbitrary"),
            vmem_limit_bytes=vmem_limit,
        ),
    )(s1p, s2p)

    # Tiny O(B*L1) epilogue in XLA: output_mask(s1_len), row sum, overlap, mean.
    max_match = max_match[:B, :L1]
    mask = (jnp.arange(L1)[None, :] < s1_len[:, None]).astype(jnp.float32)
    tot_match = jnp.sum(max_match * mask, axis=1)
    ovrl = tot_match / (s1_len.astype(jnp.float32) + 1e-10)
    return jnp.mean(1.0 - ovrl)


def word_overlap_loss_ref(s1, s2, s1_len):
    """Pure-JAX reference mirroring the PyTorch forward exactly (f32, exact matmul)."""
    s1 = s1.astype(jnp.float32)
    s2 = s2.astype(jnp.float32)
    n1 = s1 / (jnp.linalg.norm(s1, axis=2, keepdims=True) + 1e-10)
    n2 = s2 / (jnp.linalg.norm(s2, axis=2, keepdims=True) + 1e-10)
    cosine = jnp.einsum('bld,bkd->blk', n1, n2, precision=jax.lax.Precision.HIGHEST)
    cosine_em = jnp.exp(-0.5 * (cosine - 1.0) ** 2 / (0.001 ** 2))
    cosine_sm = cosine_em / (jnp.sum(cosine_em, axis=2, keepdims=True) + 1e-10)
    cosine_scaled = cosine_em * cosine_sm
    max_match = jnp.sum(cosine_scaled, axis=2)
    mask = (jnp.arange(s1.shape[1])[None, :] < s1_len[:, None]).astype(jnp.float32)
    tot_match = jnp.sum(max_match * mask, axis=1)
    ovrl = tot_match / (s1_len.astype(jnp.float32) + 1e-10)
    return jnp.mean(1.0 - ovrl)


if __name__ == "__main__":
    # Small deterministic shapes: batch=2, s1 seq=8, s2 seq=16, hidden=32.
    B, L1, L2, D = 2, 8, 16, 32
    key = jax.random.PRNGKey(0)
    k1, k2 = jax.random.split(key)
    s1 = jax.random.normal(k1, (B, L1, D), dtype=jnp.float32)
    s2 = jax.random.normal(k2, (B, L2, D), dtype=jnp.float32)
    # Plant exact word matches so the std=0.001 Gaussian does not underflow everywhere
    # (otherwise the loss is trivially 1.0 and the check proves nothing).
    s2 = s2.at[0, 0].set(s1[0, 1])
    s2 = s2.at[0, 3].set(s1[0, 4])
    s2 = s2.at[1, 2].set(s1[1, 0])
    s2 = s2.at[1, 5].set(s1[1, 2])
    s2 = s2.at[1, 9].set(s1[1, 7])
    # Keep inputs bf16 end-to-end (half DMA bytes; MXU consumes bf16 directly).
    s1 = s1.astype(jnp.bfloat16)
    s2 = s2.astype(jnp.bfloat16)
    s1_len = jnp.array([5, 8], dtype=jnp.int32)
    s2_len = jnp.array([12, 16], dtype=jnp.int32)

    loss = jax.block_until_ready(word_overlap_loss(s1, s2, s1_len, s2_len))
    ref = jax.block_until_ready(word_overlap_loss_ref(s1, s2, s1_len))

    assert jnp.isfinite(loss), "bad loss"
    assert jnp.allclose(loss, ref, atol=1e-4, rtol=1e-4), (loss, ref)
    print("KERNEL_OK")
</pallas_src>

<mosaic_0001>
module attributes {stable_mosaic.version = 11 : i64} {
  func.func @_word_overlap_kernel(%arg0: i32, %arg1: i32, %arg2: i32, %arg3: memref<2x8x128xbf16, #tpu.memory_space<vmem>>, %arg4: memref<2x128x128xbf16, #tpu.memory_space<vmem>>, %arg5: memref<2x8xf32, #tpu.memory_space<vmem>>, %arg6: memref<2x8xf32, #tpu.memory_space<vmem>>, %arg7: memref<2x8xf32, #tpu.memory_space<vmem>>, %arg8: memref<2x8x1xf32, #tpu.memory_space<vmem>>) attributes {dimension_semantics = [#tpu.dimension_semantics<parallel>, #tpu.dimension_semantics<parallel>, #tpu.dimension_semantics<arbitrary>], iteration_bounds = array<i64: 1, 1, 1>, scalar_prefetch = 0 : i64, scratch_operands = 3 : i64, tpu.core_type = #tpu.core_type<tc>, window_params = [{transform_indices = @transform_0, window_bounds = array<i64: 2, 8, 128>}, {transform_indices = @transform_1, window_bounds = array<i64: 2, 128, 128>}, {transform_indices = @transform_2, window_bounds = array<i64: 2, 8>}]} {
    %c0_i32 = arith.constant 0 : i32
    %0 = arith.cmpi eq, %arg2, %c0_i32 : i32
    %1 = arith.extui %0 : i1 to i32
    %c0_i32_0 = arith.constant 0 : i32
    %2 = arith.cmpi ne, %1, %c0_i32_0 : i32
    scf.if %2 {
      %c0_26 = arith.constant 0 : index
      %c0_27 = arith.constant 0 : index
      %c0_28 = arith.constant 0 : index
      %38 = vector.load %arg3[%c0_26, %c0_27, %c0_28] : memref<2x8x128xbf16, #tpu.memory_space<vmem>>, vector<2x8x128xbf16>
      %39 = arith.extf %38 : vector<2x8x128xbf16> to vector<2x8x128xf32>
      %40 = arith.mulf %39, %39 : vector<2x8x128xf32>
      %cst_29 = arith.constant dense<0.000000e+00> : vector<2x8xf32>
      %41 = vector.multi_reduction <add>, %40, %cst_29 [2] : vector<2x8x128xf32> to vector<2x8xf32>
      %42 = vector.shape_cast %41 : vector<2x8xf32> to vector<2x8x1xf32>
      %43 = math.sqrt %42 : vector<2x8x1xf32>
      %cst_30 = arith.constant 1.000000e-10 : f32
      %44 = vector.broadcast %cst_30 : f32 to vector<2x8x1xf32>
      %45 = arith.addf %43, %44 : vector<2x8x1xf32>
      %cst_31 = arith.constant 1.000000e+00 : f32
      %46 = vector.broadcast %cst_31 : f32 to vector<2x8x1xf32>
      %47 = arith.divf %46, %45 : vector<2x8x1xf32>
      %c0_32 = arith.constant 0 : index
      %c0_33 = arith.constant 0 : index
      %c0_34 = arith.constant 0 : index
      %48 = vector.load %arg8[%c0_32, %c0_33, %c0_34] : memref<2x8x1xf32, #tpu.memory_space<vmem>>, vector<2x8x1xf32>
      tpu.vector_store %arg8[%c0_32, %c0_33, %c0_34], %47 {strides = array<i32>} : memref<2x8x1xf32, #tpu.memory_space<vmem>>, vector<2x8x1xf32>,
      %cst_35 = arith.constant 0.000000e+00 : f32
      %49 = vector.broadcast %cst_35 : f32 to vector<2x8xf32>
      %c0_36 = arith.constant 0 : index
      %c0_37 = arith.constant 0 : index
      %50 = vector.load %arg6[%c0_36, %c0_37] : memref<2x8xf32, #tpu.memory_space<vmem>>, vector<2x8xf32>
      tpu.vector_store %arg6[%c0_36, %c0_37], %49 {strides = array<i32>} : memref<2x8xf32, #tpu.memory_space<vmem>>, vector<2x8xf32>,
      %cst_38 = arith.constant 0.000000e+00 : f32
      %51 = vector.broadcast %cst_38 : f32 to vector<2x8xf32>
      %c0_39 = arith.constant 0 : index
      %c0_40 = arith.constant 0 : index
      %52 = vector.load %arg7[%c0_39, %c0_40] : memref<2x8xf32, #tpu.memory_space<vmem>>, vector<2x8xf32>
      tpu.vector_store %arg7[%c0_39, %c0_40], %51 {strides = array<i32>} : memref<2x8xf32, #tpu.memory_space<vmem>>, vector<2x8xf32>,
    } else {
    }
    %c0 = arith.constant 0 : index
    %c0_1 = arith.constant 0 : index
    %c0_2 = arith.constant 0 : index
    %3 = vector.load %arg3[%c0, %c0_1, %c0_2] : memref<2x8x128xbf16, #tpu.memory_space<vmem>>, vector<2x8x128xbf16>
    %c0_3 = arith.constant 0 : index
    %c0_4 = arith.constant 0 : index
    %c0_5 = arith.constant 0 : index
    %4 = vector.load %arg4[%c0_3, %c0_4, %c0_5] : memref<2x128x128xbf16, #tpu.memory_space<vmem>>, vector<2x128x128xbf16>
    %5 = arith.extf %4 : vector<2x128x128xbf16> to vector<2x128x128xf32>
    %6 = arith.mulf %5, %5 : vector<2x128x128xf32>
    %cst = arith.constant dense<0.000000e+00> : vector<2x128xf32>
    %7 = vector.multi_reduction <add>, %6, %cst [2] : vector<2x128x128xf32> to vector<2x128xf32>
    %8 = math.sqrt %7 : vector<2x128xf32>
    %cst_6 = arith.constant 1.000000e-10 : f32
    %9 = vector.broadcast %cst_6 : f32 to vector<2x128xf32>
    %10 = arith.addf %8, %9 : vector<2x128xf32>
    %cst_7 = arith.constant 1.000000e+00 : f32
    %11 = vector.broadcast %cst_7 : f32 to vector<2x128xf32>
    %12 = arith.divf %11, %10 : vector<2x128xf32>
    "tpu.trace_start"() <{level = 10 : i32, message = "bld,bkd->blk"}> : () -> ()
    %cst_8 = arith.constant dense<0.000000e+00> : vector<2x8x128xf32>
    %13 = tpu.matmul %3, %4, %cst_8 {dimension_numbers = #tpu.dot_dimension_numbers<[2], [2], [1], [1], [0, 0, 0, 1, 1, 1], [0], [0]>} : vector<2x8x128xbf16>, vector<2x128x128xbf16>, vector<2x8x128xf32> -> vector<2x8x128xf32>
    "tpu.trace_stop"() : () -> ()
    %c0_9 = arith.constant 0 : index
    %c0_10 = arith.constant 0 : index
    %c0_11 = arith.constant 0 : index
    %14 = vector.load %arg8[%c0_9, %c0_10, %c0_11] : memref<2x8x1xf32, #tpu.memory_space<vmem>>, vector<2x8x1xf32>
    %15 = vector.broadcast %14 : vector<2x8x1xf32> to vector<2x8x128xf32>
    %16 = arith.mulf %13, %15 : vector<2x8x128xf32>
    %17 = vector.shape_cast %12 : vector<2x128xf32> to vector<2x1x128xf32>
    %18 = vector.broadcast %17 : vector<2x1x128xf32> to vector<2x8x128xf32>
    %19 = arith.mulf %16, %18 : vector<2x8x128xf32>
    %cst_12 = arith.constant 1.000000e+00 : f32
    %20 = vector.broadcast %cst_12 : f32 to vector<2x8x128xf32>
    %21 = arith.subf %19, %20 : vector<2x8x128xf32>
    %22 = arith.mulf %21, %21 : vector<2x8x128xf32>
    %cst_13 = arith.constant -5.000000e+05 : f32
    %23 = vector.broadcast %cst_13 : f32 to vector<2x8x128xf32>
    %24 = arith.mulf %22, %23 : vector<2x8x128xf32>
    %25 = math.exp %24 : vector<2x8x128xf32>
    %c0_14 = arith.constant 0 : index
    %c0_15 = arith.constant 0 : index
    %26 = vector.load %arg6[%c0_14, %c0_15] : memref<2x8xf32, #tpu.memory_space<vmem>>, vector<2x8xf32>
    %cst_16 = arith.constant dense<0.000000e+00> : vector<2x8xf32>
    %27 = vector.multi_reduction <add>, %25, %cst_16 [2] : vector<2x8x128xf32> to vector<2x8xf32>
    %28 = arith.addf %26, %27 : vector<2x8xf32>
    %c0_17 = arith.constant 0 : index
    %c0_18 = arith.constant 0 : index
    %29 = vector.load %arg6[%c0_17, %c0_18] : memref<2x8xf32, #tpu.memory_space<vmem>>, vector<2x8xf32>
    tpu.vector_store %arg6[%c0_17, %c0_18], %28 {strides = array<i32>} : memref<2x8xf32, #tpu.memory_space<vmem>>, vector<2x8xf32>,
    %c0_19 = arith.constant 0 : index
    %c0_20 = arith.constant 0 : index
    %30 = vector.load %arg7[%c0_19, %c0_20] : memref<2x8xf32, #tpu.memory_space<vmem>>, vector<2x8xf32>
    %31 = arith.mulf %25, %25 : vector<2x8x128xf32>
    %cst_21 = arith.constant dense<0.000000e+00> : vector<2x8xf32>
    %32 = vector.multi_reduction <add>, %31, %cst_21 [2] : vector<2x8x128xf32> to vector<2x8xf32>
    %33 = arith.addf %30, %32 : vector<2x8xf32>
    %c0_22 = arith.constant 0 : index
    %c0_23 = arith.constant 0 : index
    %34 = vector.load %arg7[%c0_22, %c0_23] : memref<2x8xf32, #tpu.memory_space<vmem>>, vector<2x8xf32>
    tpu.vector_store %arg7[%c0_22, %c0_23], %33 {strides = array<i32>} : memref<2x8xf32, #tpu.memory_space<vmem>>, vector<2x8xf32>,
    %c0_i32_24 = arith.constant 0 : i32
    %35 = arith.cmpi eq, %arg2, %c0_i32_24 : i32
    %36 = arith.extui %35 : i1 to i32
    %c0_i32_25 = arith.constant 0 : i32
    %37 = arith.cmpi ne, %36, %c0_i32_25 : i32
    scf.if %37 {
      %c0_26 = arith.constant 0 : index
      %c0_27 = arith.constant 0 : index
      %38 = vector.load %arg7[%c0_26, %c0_27] : memref<2x8xf32, #tpu.memory_space<vmem>>, vector<2x8xf32>
      %c0_28 = arith.constant 0 : index
      %c0_29 = arith.constant 0 : index
      %39 = vector.load %arg6[%c0_28, %c0_29] : memref<2x8xf32, #tpu.memory_space<vmem>>, vector<2x8xf32>
      %cst_30 = arith.constant 1.000000e-10 : f32
      %40 = vector.broadcast %cst_30 : f32 to vector<2x8xf32>
      %41 = arith.addf %39, %40 : vector<2x8xf32>
      %42 = arith.divf %38, %41 : vector<2x8xf32>
      %c0_31 = arith.constant 0 : index
      %c0_32 = arith.constant 0 : index
      %43 = vector.load %arg5[%c0_31, %c0_32] : memref<2x8xf32, #tpu.memory_space<vmem>>, vector<2x8xf32>
      tpu.vector_store %arg5[%c0_31, %c0_32], %42 {strides = array<i32>} : memref<2x8xf32, #tpu.memory_space<vmem>>, vector<2x8xf32>,
    } else {
    }
    return
  }
  func.func @transform_0(%arg0: i32, %arg1: i32, %arg2: i32) -> (i32, i32, i32) {
    %c0_i32 = arith.constant 0 : i32
    %c0_i32_0 = arith.constant 0 : i32
    return %arg0, %arg1, %c0_i32 : i32, i32, i32
  }
  func.func @transform_1(%arg0: i32, %arg1: i32, %arg2: i32) -> (i32, i32, i32) {
    %c0_i32 = arith.constant 0 : i32
    %c0_i32_0 = arith.constant 0 : i32
    return %arg0, %arg2, %c0_i32 : i32, i32, i32
  }
  func.func @transform_2(%arg0: i32, %arg1: i32, %arg2: i32) -> (i32, i32) {
    %c0_i32 = arith.constant 0 : i32
    return %arg0, %arg1 : i32, i32
  }
}

</mosaic_0001>

<bundles_post_ra>
// kernel: tpu_custom_call.1
= control target key start
LH: loop header
LB: loop body
LE: loop exit
PB: predicated region body
PF: predicated region fallthrough
CT: control target
= control target key end

     0   :  { %7 = vsyncpa [#allocation6], 0  ;;  %s2030_s0 = inlined_call_operand.hbm [shape: bf16[2,8,128], index: 0, kind: input, shape index: {}]   ;;  %s2031_s1 = inlined_call_operand.hbm [shape: bf16[2,128,128], index: 1, kind: input, shape index: {}]   ;;  %s2032_s2 = inlined_call_operand.hbm [shape: f32[2,8], index: 2, kind: output, shape index: {}]  }
   0x1   :  { %8 = vsyncpa [#allocation9], 0 }
   0x2   :  { %9 = vsyncpa [#allocation7], 0  ;;  %s1410_s9 = smov [#allocation5]   ;;  %s1338_s13 = scalar_lea.hbm %s2030_s0, 128 }
   0x3   :  { %s15_s10 = sshll.u32 %s1410_s9, 4  ;;  %p1339_p0 = scmp.ne.s32.totalorder %s2030_s0, %s1338_s13  ;;  %s16_s10 = int_to_ptr.vmem [resolvable:$true] %s15_s10 }
   0x4   :  { %p1342_p1 = scmp.lt.u32.totalorder %s1338_s13, %s2030_s0 }
   0x6   :  { %p1344_p2 = pnand %p1342_p1, %p1339_p0 }
   0x8   :  { %1347 = shalt.err (!%p1344_p2)
}
   0x9   :  { %s1348_s18 = scalar_lea.vmem %s16_s10, 128  ;;  %p1353_p4 = scmp.lt.s32.totalorder %s16_s10, %s16_s10 }
   0xa   :  { %p1349_p3 = scmp.ne.s32.totalorder %s16_s10, %s1348_s18  ;;  %p1354_p5 = scmp.lt.s32.totalorder %s1348_s18, %s1348_s18 }
   0xc   :  { %p1355_p6 = por %p1354_p5, %p1353_p4 }
   0xe   :  { %p1356_p7 = pnand %p1355_p6, %p1349_p3 }
  0x10   :  { %1359 = shalt.err (!%p1356_p7)
}
  0x11   :  { %s1411_s19 = smov 64   ;;  %s1412_s20 = smov 4  }
  0x12   :  { %21 = dma.hbm_to_vmem [thread:$0]  %s2030_s0, 128, %s16_s10, [#allocation6], %s1411_s19, %s1411_s19, %s1412_s20  }
  0x13   :  { %s1413_s23 = smov [#allocation8]   ;;  %s1360_s27 = scalar_lea.hbm %s2031_s1, 2048 }
  0x14   :  { %s27_s24 = sshll.u32 %s1413_s23, 4  ;;  %p1361_p8 = scmp.ne.s32.totalorder %s2031_s1, %s1360_s27  ;;  %s28_s24 = int_to_ptr.vmem [resolvable:$true] %s27_s24 }
  0x15   :  { %p1364_p9 = scmp.lt.u32.totalorder %s1360_s27, %s2031_s1 }
  0x17   :  { %p1366_p10 = pnand %p1364_p9, %p1361_p8 }
  0x19   :  { %1369 = shalt.err (!%p1366_p10)
}
  0x1a   :  { %s1370_s4 = scalar_lea.vmem %s28_s24, 2048  ;;  %p1375_p12 = scmp.lt.s32.totalorder %s28_s24, %s28_s24 }
  0x1b   :  { %p1371_p11 = scmp.ne.s32.totalorder %s28_s24, %s1370_s4  ;;  %p1376_p13 = scmp.lt.s32.totalorder %s1370_s4, %s1370_s4 }
  0x1d   :  { %p1377_p0 = por %p1376_p13, %p1375_p12 }
  0x1f   :  { %p1378_p1 = pnand %p1377_p0, %p1371_p11 }
  0x21   :  { %1381 = shalt.err (!%p1378_p1)
}
  0x22   :  { %33 = dma.hbm_to_vmem [thread:$0]  %s2031_s1, 2048, %s28_s24, [#allocation9], %s1411_s19, %s1411_s19, %s1412_s20  }
  0x23   :  { %1404 = dma.done.wait [#allocation6], 128  }
  0x24   :  { %1405 = vsyncadd [#allocation6], 4294967168 }
  0x25   :  { %1406 = dma.done.wait [#allocation9], 2048  }
  0x26   :  { %1407 = vsyncadd [#allocation9], 4294965248  ;;  %v1414_v0 = vmov 0.0   ;;  %vm1415_vm0 = vmmov 0   ;;  %v1093_v1 = vld [vmem:[#allocation5] sm:$0xff]   ;;  %v83_v2 = vld [vmem:[#allocation8] sm:$0xff]  }
  0x27   :  { %1114 = vmatprep.subr.bf16.mxu0 %v1414_v0  ;;  %1134 = vmatprep.subr.bf16.mxu1 %v1414_v0  ;;  %v1094_v3 = vunpack.c.l.bf16 %v1093_v1  ;;  %v1095_v4 = vunpack.c.h.bf16 %v1093_v1  ;;  %v115_v5 = vunpack.c.l.bf16 %v83_v2  ;;  %v99_v6 = vld [vmem:[#allocation8 + $0x40] sm:$0xff]   ;;  %v116_v7 = vunpack.c.h.bf16 %v83_v2  ;;  %v85_v14 = vld [vmem:[#allocation8 + $0x8] sm:$0xff]   ;;  %v87_v24 = vld [vmem:[#allocation8 + $0x10] sm:$0xff]   ;;  %s1417_s1 = smov [#allocation10]  }
  0x28   :  { %1130 = vmatprep.mubr.msk.bf16.mxu0 %vm1415_vm0, %v1414_v0  ;;  %1150 = vmatprep.mubr.msk.bf16.mxu1 %vm1415_vm0, %v1414_v0  ;;  %v131_v10 = vunpack.c.l.bf16 %v99_v6  ;;  %v132_v11 = vunpack.c.h.bf16 %v99_v6  ;;  %v101_v15 = vld [vmem:[#allocation8 + $0x48] sm:$0xff]   ;;  %v117_v17 = vunpack.c.l.bf16 %v85_v14  ;;  %v118_v21 = vunpack.c.h.bf16 %v85_v14  ;;  %v103_v25 = vld [vmem:[#allocation8 + $0x50] sm:$0xff]   ;;  %v89_v34 = vld [vmem:[#allocation8 + $0x18] sm:$0xff]   ;;  %s1064_s6 = sshll.u32 %s1417_s1, 4  ;;  %s1065_s6 = int_to_ptr.vmem [resolvable:$true] %s1064_s6 }
  0x29   :  { %v49_v8 = vmul.f32 %v1094_v3, %v1094_v3  ;;  %v147_v9 = vmul.f32 %v115_v5, %v115_v5  ;;  %v50_v12 = vmul.f32 %v1095_v4, %v1095_v4  ;;  %v148_v13 = vmul.f32 %v116_v7, %v116_v7  ;;  %1115 = vmatpush3.bf16.xpose.msra.mxu0 %v83_v2  ;;  %v105_v35 = vld [vmem:[#allocation8 + $0x58] sm:$0xff]   ;;  %v91_v44 = vld [vmem:[#allocation8 + $0x20] sm:$0xff]   ;;  %v93_v54 = vld [vmem:[#allocation8 + $0x28] sm:$0xff]   ;;  %s1382_s7 = scalar_lea.vmem %s1065_s6, 32  ;;  %p1387_p3 = scmp.lt.s32.totalorder %s1065_s6, %s1065_s6 }
  0x2a   :  { %1135 = vmatpush3.bf16.xpose.msra.mxu1 %v99_v6  ;;  %1116 = vmatprep.subr.bf16.mxu0 %v1414_v0  ;;  %v163_v16 = vmul.f32 %v131_v10, %v131_v10  ;;  %v164_v18 = vmul.f32 %v132_v11, %v132_v11  ;;  %v133_v19 = vunpack.c.l.bf16 %v101_v15  ;;  %v149_v20 = vmul.f32 %v117_v17, %v117_v17  ;;  %v107_v45 = vld [vmem:[#allocation8 + $0x60] sm:$0xff]   ;;  %v109_v55 = vld [vmem:[#allocation8 + $0x68] sm:$0xff]   ;;  %v95_v1 = vld [vmem:[#allocation8 + $0x30] sm:$0xff]   ;;  %p1383_p2 = scmp.ne.s32.totalorder %s1065_s6, %s1382_s7  ;;  %p1388_p4 = scmp.lt.s32.totalorder %s1382_s7, %s1382_s7 }
  0x2b   :  { %51 = vadd.xlane.f32.xlu0 %v49_v8  ;;  %179 = vadd.xlane.f32.xlu1 %v147_v9  ;;  %v134_v23 = vunpack.c.h.bf16 %v101_v15  ;;  %v150_v26 = vmul.f32 %v118_v21, %v118_v21  ;;  %v119_v27 = vunpack.c.l.bf16 %v87_v24  ;;  %v135_v29 = vunpack.c.l.bf16 %v103_v25  ;;  %v111_v2 = vld [vmem:[#allocation8 + $0x70] sm:$0xff]   ;;  %v97_v11 = vld [vmem:[#allocation8 + $0x38] sm:$0xff]  }
  0x2c   :  { %1136 = vmatprep.subr.bf16.mxu1 %v1414_v0  ;;  %v165_v22 = vmul.f32 %v133_v19, %v133_v19  ;;  %v120_v31 = vunpack.c.h.bf16 %v87_v24  ;;  %v136_v33 = vunpack.c.h.bf16 %v103_v25  ;;  %v121_v37 = vunpack.c.l.bf16 %v89_v34  ;;  %p1389_p5 = por %p1388_p4, %p1387_p3 }
  0x2d   :  { %v166_v28 = vmul.f32 %v134_v23, %v134_v23  ;;  %v151_v30 = vmul.f32 %v119_v27, %v119_v27  ;;  %v167_v32 = vmul.f32 %v135_v29, %v135_v29  ;;  %v137_v39 = vunpack.c.l.bf16 %v105_v35 }
  0x2e   :  { %v152_v36 = vmul.f32 %v120_v31, %v120_v31  ;;  %v168_v38 = vmul.f32 %v136_v33, %v136_v33  ;;  %v153_v40 = vmul.f32 %v121_v37, %v121_v37  ;;  %v122_v41 = vunpack.c.h.bf16 %v89_v34  ;;  %p1390_p6 = pnand %p1389_p5, %p1383_p2 }
  0x2f   :  { %53 = vadd.xlane.f32.xlu0 %v50_v12  ;;  %181 = vadd.xlane.f32.xlu1 %v148_v13  ;;  %v169_v42 = vmul.f32 %v137_v39, %v137_v39  ;;  %v138_v43 = vunpack.c.h.bf16 %v105_v35  ;;  %v123_v47 = vunpack.c.l.bf16 %v91_v44  ;;  %v139_v49 = vunpack.c.l.bf16 %v107_v45  ;;  %v113_v12 = vld [vmem:[#allocation8 + $0x78] sm:$0xff]  }
  0x30   :  { %v154_v46 = vmul.f32 %v122_v41, %v122_v41  ;;  %v124_v51 = vunpack.c.h.bf16 %v91_v44  ;;  %v140_v53 = vunpack.c.h.bf16 %v107_v45  ;;  %v125_v57 = vunpack.c.l.bf16 %v93_v54 }
  0x31   :  { %1117 = vmatpush3.bf16.xpose.msra.mxu0 %v85_v14  ;;  %v170_v48 = vmul.f32 %v138_v43, %v138_v43  ;;  %v155_v50 = vmul.f32 %v123_v47, %v123_v47  ;;  %v171_v52 = vmul.f32 %v139_v49, %v139_v49  ;;  %v141_v59 = vunpack.c.l.bf16 %v109_v55 }
  0x32   :  { %1137 = vmatpush3.bf16.xpose.msra.mxu1 %v101_v15  ;;  %1118 = vmatprep.subr.bf16.mxu0 %v1414_v0  ;;  %v156_v56 = vmul.f32 %v124_v51, %v124_v51  ;;  %v172_v58 = vmul.f32 %v140_v53, %v140_v53  ;;  %v157_v60 = vmul.f32 %v125_v57, %v125_v57  ;;  %v126_v61 = vunpack.c.h.bf16 %v93_v54 }
  0x33   :  { %211 = vadd.xlane.f32.xlu0 %v163_v16  ;;  %213 = vadd.xlane.f32.xlu1 %v164_v18  ;;  %v173_v62 = vmul.f32 %v141_v59, %v141_v59  ;;  %v142_v63 = vunpack.c.h.bf16 %v109_v55  ;;  %v127_v4 = vunpack.c.l.bf16 %v95_v1  ;;  %v143_v6 = vunpack.c.l.bf16 %v111_v2 }
  0x34   :  { %1138 = vmatprep.subr.bf16.mxu1 %v1414_v0  ;;  %v158_v3 = vmul.f32 %v126_v61, %v126_v61  ;;  %v128_v7 = vunpack.c.h.bf16 %v95_v1  ;;  %v144_v10 = vunpack.c.h.bf16 %v111_v2  ;;  %v1416_v13 = vmov 0  }
  0x35   :  { %v174_v5 = vmul.f32 %v142_v63, %v142_v63  ;;  %v159_v8 = vmul.f32 %v127_v4, %v127_v4  ;;  %v175_v9 = vmul.f32 %v143_v6, %v143_v6  ;;  %1162 = vset.pattern.permute.xlu0 %v1416_v13  ;;  %1163 = vset.pattern.permute.xlu1 %v1416_v13  ;;  %v129_v15 = vunpack.c.l.bf16 %v97_v11 }
  0x36   :  { %v160_v14 = vmul.f32 %v128_v7, %v128_v7  ;;  %v176_v16 = vmul.f32 %v144_v10, %v144_v10  ;;  %v145_v17 = vunpack.c.l.bf16 %v113_v12  ;;  %v130_v19 = vunpack.c.h.bf16 %v97_v11 }
  0x37   :  { %183 = vadd.xlane.f32.xlu0 %v149_v20  ;;  %215 = vadd.xlane.f32.xlu1 %v165_v22  ;;  %v161_v18 = vmul.f32 %v129_v15, %v129_v15  ;;  %v146_v21 = vunpack.c.h.bf16 %v113_v12  ;;  %vm75_vm5 = vcmask 7168   ;;  %v785_v53 = vlaneseq }
  0x38   :  { %v177_v20 = vmul.f32 %v145_v17, %v145_v17  ;;  %v162_v22 = vmul.f32 %v130_v19, %v130_v19 }
  0x39   :  { %1119 = vmatpush3.bf16.xpose.msra.mxu0 %v87_v24  ;;  %v178_v23 = vmul.f32 %v146_v21, %v146_v21  ;;  %v81_v24 = vld [vmem:[#allocation5] sm:$0xf] }
  0x3a   :  { %1139 = vmatpush3.bf16.xpose.msra.mxu1 %v103_v25  ;;  %1120 = vmatprep.subr.bf16.mxu0 %v1414_v0  ;;  %v82_v25 = vld [vmem:[#allocation5 + $0x4] sm:$0xf] }
  0x3b   :  { %185 = vadd.xlane.f32.xlu0 %v150_v26  ;;  %217 = vadd.xlane.f32.xlu1 %v166_v28 }
  0x3c   :  { %1140 = vmatprep.subr.bf16.mxu1 %v1414_v0 }
  0x3f   :  { %187 = vadd.xlane.f32.xlu0 %v151_v30  ;;  %219 = vadd.xlane.f32.xlu1 %v167_v32 }
  0x41   :  { %1121 = vmatpush3.bf16.xpose.msra.mxu0 %v89_v34 }
  0x42   :  { %1141 = vmatpush3.bf16.xpose.msra.mxu1 %v105_v35  ;;  %1122 = vmatprep.subr.bf16.mxu0 %v1414_v0 }
  0x43   :  { %189 = vadd.xlane.f32.xlu0 %v152_v36  ;;  %221 = vadd.xlane.f32.xlu1 %v168_v38 }
  0x44   :  { %1142 = vmatprep.subr.bf16.mxu1 %v1414_v0 }
  0x47   :  { %191 = vadd.xlane.f32.xlu0 %v153_v40  ;;  %223 = vadd.xlane.f32.xlu1 %v169_v42 }
  0x49   :  { %1123 = vmatpush3.bf16.xpose.msra.mxu0 %v91_v44 }
  0x4a   :  { %1143 = vmatpush3.bf16.xpose.msra.mxu1 %v107_v45  ;;  %1124 = vmatprep.subr.bf16.mxu0 %v1414_v0 }
  0x4b   :  { %193 = vadd.xlane.f32.xlu0 %v154_v46  ;;  %225 = vadd.xlane.f32.xlu1 %v170_v48 }
  0x4c   :  { %1144 = vmatprep.subr.bf16.mxu1 %v1414_v0 }
  0x4f   :  { %195 = vadd.xlane.f32.xlu0 %v155_v50  ;;  %227 = vadd.xlane.f32.xlu1 %v171_v52 }
  0x51   :  { %1125 = vmatpush3.bf16.xpose.msra.mxu0 %v93_v54 }
  0x52   :  { %1145 = vmatpush3.bf16.xpose.msra.mxu1 %v109_v55  ;;  %1126 = vmatprep.subr.bf16.mxu0 %v1414_v0  ;;  %v1496_v55 = vand.u32 127, %v785_v53 }
  0x53   :  { %197 = vadd.xlane.f32.xlu0 %v156_v56  ;;  %229 = vadd.xlane.f32.xlu1 %v172_v58  ;;  %v1502_v58 = vshrl.u32 %v785_v53, 7 }
  0x54   :  { %1146 = vmatprep.subr.bf16.mxu1 %v1414_v0  ;;  %v791_v61 = vadd.s32 4294967288, %v1496_v55  ;;  %v805_v63 = vadd.s32 4294967272, %v1496_v55  ;;  %v826_v4 = vadd.s32 4294967248, %v1496_v55 }
  0x56   :  { %v1540_v19 = vsub.s32 %v826_v4, %v1502_v58 }
  0x57   :  { %199 = vadd.xlane.f32.xlu0 %v157_v60  ;;  %231 = vadd.xlane.f32.xlu1 %v173_v62  ;;  %v798_v62 = vadd.s32 4294967280, %v1496_v55 }
  0x59   :  { %1127 = vmatpush3.bf16.xpose.msra.mxu0 %v95_v1  ;;  %v1526_v13 = vsub.s32 %v798_v62, %v1502_v58 }
  0x5a   :  { %1147 = vmatpush3.bf16.xpose.msra.mxu1 %v111_v2  ;;  %1128 = vmatprep.subr.bf16.mxu0 %v1414_v0  ;;  %v812_v2 = vadd.s32 4294967264, %v1496_v55 }
  0x5b   :  { %201 = vadd.xlane.f32.xlu0 %v158_v3  ;;  %233 = vadd.xlane.f32.xlu1 %v174_v5  ;;  %v819_v3 = vadd.s32 4294967256, %v1496_v55  ;;  %v1515_v5 = vsub.s32 %v1496_v55, %v1502_v58 }
  0x5c   :  { %1148 = vmatprep.subr.bf16.mxu1 %v1414_v0  ;;  %v1534_v17 = vsub.s32 %v812_v2, %v1502_v58 }
  0x5f   :  { %203 = vadd.xlane.f32.xlu0 %v159_v8  ;;  %235 = vadd.xlane.f32.xlu1 %v175_v9 }
  0x61   :  { %1129 = vmatpush3.bf16.xpose.msra.mxu0 %v97_v11 }
  0x62   :  { %1149 = vmatpush3.bf16.xpose.msra.mxu1 %v113_v12  ;;  %v1523_v12 = vsub.s32 %v791_v61, %v1502_v58 }
  0x63   :  { %205 = vadd.xlane.f32.xlu0 %v160_v14  ;;  %237 = vadd.xlane.f32.xlu1 %v176_v16  ;;  %v1529_v14 = vsub.s32 %v805_v63, %v1502_v58 }
  0x67   :  { %207 = vadd.xlane.f32.xlu0 %v161_v18  ;;  %239 = vadd.xlane.f32.xlu1 %v177_v20  ;;  %v1537_v18 = vsub.s32 %v819_v3, %v1502_v58 }
  0x68   :  { %1131 = vmatmul.mubr.bf16.vlgmr.msra.gmra.mrb[0].mxu0 %v81_v24 }
  0x69   :  { %1151 = vmatmul.mubr.bf16.vlgmr.msra.gmra.mrb[0].mxu1 %v82_v25 }
  0x6b   :  { %209 = vadd.xlane.f32.xlu0 %v162_v22  ;;  %241 = vadd.xlane.f32.xlu1 %v178_v23 }
  0xb8   :  { %v52_v26 = vpop.xlane.xlu0 %51  ;;  %v180_v40 = vpop.xlane.xlu1 %179 }
  0xb9   :  { %1196 = vrsqrt.f32 %v52_v26  ;;  %vm57_vm1 = vcmp.eq.f32.partialorder %v52_v26, inf  ;;  %v60_v30 = vand.u32 2147483648, %v52_v26  ;;  %vm59_vm2 = vcmp.eq.f32.partialorder %v52_v26, 0.0 }
  0xba   :  { %vm245_vm6 = vcmp.eq.f32.partialorder %v180_v40, inf  ;;  %v248_v6 = vand.u32 2147483648, %v180_v40  ;;  %vm247_vm7 = vcmp.eq.f32.partialorder %v180_v40, 0.0 }
  0xbc   :  { %v54_v27 = vpop.xlane.xlu0 %53  ;;  %v1475_v43 = vpop.xlane.xlu1 %181 }
  0xbd   :  { %1198 = vrsqrt.f32 %v54_v27  ;;  %vm64_vm3 = vcmp.eq.f32.partialorder %v54_v27, inf  ;;  %v67_v36 = vand.u32 2147483648, %v54_v27  ;;  %vm66_vm4 = vcmp.eq.f32.partialorder %v54_v27, 0.0 }
  0xbe   :  { %vm252_vm8 = vcmp.eq.f32.partialorder %v1475_v43, inf  ;;  %v255_v16 = vand.u32 2147483648, %v1475_v43  ;;  %vm254_vm9 = vcmp.eq.f32.partialorder %v1475_v43, 0.0 }
  0xc0   :  { %v1477_v44 = vpop.xlane.xlu0 %211  ;;  %v1479_v46 = vpop.xlane.xlu1 %213 }
  0xc1   :  { %vm357_vm10 = vcmp.eq.f32.partialorder %v1477_v44, inf  ;;  %vm359_vm11 = vcmp.eq.f32.partialorder %v1477_v44, 0.0  ;;  %vm364_vm12 = vcmp.eq.f32.partialorder %v1479_v46, inf  ;;  %vm366_vm14 = vcmp.eq.f32.partialorder %v1479_v46, 0.0 }
  0xc3   :  { %v1197_v28 = vpop.eup %1196 }
  0xc4   :  { %v56_v29 = vmul.f32 %v1197_v28, %v52_v26  ;;  %v1481_v48 = vpop.xlane.xlu0 %183  ;;  %v1483_v49 = vpop.xlane.xlu1 %215 }
  0xc5   :  { %vm259_vm13 = vcmp.eq.f32.partialorder %v1481_v48, inf  ;;  %vm371_vm15 = vcmp.eq.f32.partialorder %v1483_v49, inf  ;;  %vm261_vm0 = vcmp.eq.f32.partialorder %v1481_v48, 0.0 }
  0xc6   :  { %v58_v31 = vsel %vm57_vm1, %v52_v26, %v56_v29  ;;  %v1551_v26 = vadd.s32 4294967240, %v1496_v55  ;;  %vm373_vm1 = vcmp.eq.f32.partialorder %v1483_v49, 0.0 }
  0xc7   :  { %v1199_v32 = vpop.eup %1198  ;;  %v61_v33 = vsel %vm59_vm2, %v60_v30, %v58_v31 }
  0xc8   :  { %v69_v34 = vadd.f32 1e-10, %v61_v33  ;;  %v63_v35 = vmul.f32 %v1199_v32, %v54_v27  ;;  %v1485_v50 = vpop.xlane.xlu0 %185  ;;  %v1487_v51 = vpop.xlane.xlu1 %217 }
  0xc9   :  { %vm266_vm2 = vcmp.eq.f32.partialorder %v1485_v50, inf }
  0xca   :  { %1200 = vrcp.f32 %v69_v34  ;;  %v65_v37 = vsel %vm64_vm3, %v54_v27, %v63_v35  ;;  %v360_v27 = vand.u32 2147483648, %v1477_v44  ;;  %v367_v34 = vand.u32 2147483648, %v1479_v46 }
  0xcb   :  { %v68_v38 = vsel %vm66_vm4, %v67_v36, %v65_v37  ;;  %v262_v36 = vand.u32 2147483648, %v1481_v48  ;;  %vm268_vm3 = vcmp.eq.f32.partialorder %v1485_v50, 0.0  ;;  %vm378_vm4 = vcmp.eq.f32.partialorder %v1487_v51, inf }
  0xcc   :  { %v70_v39 = vadd.f32 1e-10, %v68_v38  ;;  %v1490_v52 = vpop.xlane.xlu0 %187  ;;  %v1494_v54 = vpop.xlane.xlu1 %219 }
  0xce   :  { %1202 = vrcp.f32 %v70_v39 }
  0xcf   :  { %1204 = vrsqrt.f32 %v180_v40 }
  0xd0   :  { %1206 = vrsqrt.f32 %v1475_v43  ;;  %v1499_v57 = vpop.xlane.xlu0 %189  ;;  %v1508_v1 = vpop.xlane.xlu1 %221 }
  0xd1   :  { %1208 = vrsqrt.f32 %v1477_v44 }
  0xd2   :  { %1210 = vrsqrt.f32 %v1479_v46 }
  0xd3   :  { %1212 = vrsqrt.f32 %v1481_v48 }
  0xd4   :  { %v1201_v41 = vpop.eup %1200  ;;  %1214 = vrsqrt.f32 %v1483_v49  ;;  %v1518_v8 = vpop.xlane.xlu0 %191 }
  0xd5   :  { %76 = vst.msk [vmem:[#allocation4] sm:$0xff] %vm75_vm5, %v1201_v41  ;;  %1216 = vrsqrt.f32 %v1485_v50  ;;  %v1545_v23 = vpop.xlane.xlu1 %223 }
  0xd6   :  { %1218 = vrsqrt.f32 %v1487_v51 }
  0xd7   :  { %1220 = vrsqrt.f32 %v1490_v52 }
  0xd8   :  { %v1203_v42 = vpop.eup %1202  ;;  %1222 = vrsqrt.f32 %v1499_v57  ;;  %v1557_v29 = vpop.xlane.xlu0 %193 }
  0xd9   :  { %77 = vst.msk [vmem:[#allocation4 + $0x8] sm:$0xff] %vm75_vm5, %v1203_v42  ;;  %v1205_v56 = vpop.eup %1204  ;;  %1224 = vrsqrt.f32 %v1494_v54  ;;  %vm273_vm5 = vcmp.eq.f32.partialorder %v1490_v52, inf }
  0xda   :  { %v1207_v59 = vpop.eup %1206  ;;  %v244_v60 = vmul.f32 %v1205_v56, %v180_v40  ;;  %1226 = vrsqrt.f32 %v1518_v8 }
  0xdb   :  { %v251_v7 = vmul.f32 %v1207_v59, %v1475_v43  ;;  %v1209_v9 = vpop.eup %1208 }
  0xdc   :  { %v739_v45 = vld [vmem:[#allocation4] sm:$0xff]  ;;  %v246_v10 = vsel %vm245_vm6, %v180_v40, %v244_v60  ;;  %v1211_v11 = vpop.eup %1210  ;;  %v356_v21 = vmul.f32 %v1209_v9, %v1477_v44  ;;  %v1572_v40 = vpop.xlane.xlu1 %225  ;;  %v1601_v9 = vadd.s32 4294967224, %v1496_v55  ;;  %vm275_vm6 = vcmp.eq.f32.partialorder %v1490_v52, 0.0 }
  0xdd   :  { %743 = vperm.xlu0 %1162, %v739_v45   ;;  %v1213_v15 = vpop.eup %1212  ;;  %v249_v20 = vsel %vm247_vm7, %v248_v6, %v246_v10  ;;  %v253_v22 = vsel %vm252_vm8, %v1475_v43, %v251_v7  ;;  %v363_v25 = vmul.f32 %v1211_v11, %v1479_v46  ;;  %v374_v45 = vand.u32 2147483648, %v1483_v49  ;;  %v1583_v56 = vpop.xlane.xlu0 %195 }
  0xde   :  { %v1215_v24 = vpop.eup %1214  ;;  %v258_v28 = vmul.f32 %v1213_v15, %v1481_v48  ;;  %v467_v30 = vadd.f32 1e-10, %v249_v20  ;;  %v256_v31 = vsel %vm254_vm9, %v255_v16, %v253_v22  ;;  %v358_v33 = vsel %vm357_vm10, %v1477_v44, %v356_v21 }
  0xdf   :  { %v1217_v32 = vpop.eup %1216  ;;  %v370_v35 = vmul.f32 %v1215_v24, %v1483_v49  ;;  %v365_v37 = vsel %vm364_vm12, %v1479_v46, %v363_v25  ;;  %v468_v38 = vadd.f32 1e-10, %v256_v31  ;;  %v361_v42 = vsel %vm359_vm11, %v360_v27, %v358_v33 }
  0xe0   :  { %v740_v47 = vld [vmem:[#allocation4 + $0x8] sm:$0xff]  ;;  %v260_v39 = vsel %vm259_vm13, %v1481_v48, %v258_v28  ;;  %v1219_v41 = vpop.eup %1218  ;;  %1228 = vrcp.f32 %v467_v30  ;;  %v265_v43 = vmul.f32 %v1217_v32, %v1485_v50  ;;  %v368_v53 = vsel %vm366_vm14, %v367_v34, %v365_v37  ;;  %v1595_v6 = vpop.xlane.xlu1 %227 }
  0xe1   :  { %748 = vperm.xlu1 %1163, %v740_v47   ;;  %v1221_v47 = vpop.eup %1220  ;;  %v372_v48 = vsel %vm371_vm15, %v1483_v49, %v370_v35  ;;  %1230 = vrsqrt.f32 %v1508_v1  ;;  %v263_v59 = vsel %vm261_vm0, %v262_v36, %v260_v39  ;;  %v269_v44 = vand.u32 2147483648, %v1485_v50  ;;  %v1612_v21 = vpop.xlane.xlu0 %197 }
  0xe2   :  { %1232 = vrsqrt.f32 %v1557_v29  ;;  %v483_v60 = vadd.f32 1e-10, %v361_v42  ;;  %v377_v46 = vmul.f32 %v1219_v41, %v1487_v51  ;;  %v484_v61 = vadd.f32 1e-10, %v368_v53  ;;  %v1223_v3 = vpop.eup %1222 }
  0xe3   :  { %1234 = vrcp.f32 %v468_v38  ;;  %v267_v62 = vsel %vm266_vm2, %v1485_v50, %v265_v43  ;;  %v375_v63 = vsel %vm373_vm1, %v374_v45, %v372_v48  ;;  %v272_v2 = vmul.f32 %v1221_v47, %v1490_v52  ;;  %v1225_v10 = vpop.eup %1224 }
  0xe4   :  { %v469_v4 = vadd.f32 1e-10, %v263_v59  ;;  %v1598_v7 = vadd.s32 4294967232, %v1496_v55  ;;  %v276_v49 = vand.u32 2147483648, %v1490_v52  ;;  %vm380_vm7 = vcmp.eq.f32.partialorder %v1487_v51, 0.0  ;;  %v1227_v22 = vpop.eup %1226  ;;  %v1632_v35 = vpop.xlane.xlu1 %229 }
  0xe5   :  { %v381_v11 = vand.u32 2147483648, %v1487_v51  ;;  %1236 = vrcp.f32 %v483_v60  ;;  %v270_v15 = vsel %vm268_vm3, %v269_v44, %v267_v62  ;;  %v485_v16 = vadd.f32 1e-10, %v375_v63  ;;  %v1645_v42 = vpop.xlane.xlu0 %199 }
  0xe6   :  { %v379_v20 = vsel %vm378_vm4, %v1487_v51, %v377_v46  ;;  %1238 = vrcp.f32 %v484_v61  ;;  %v274_v24 = vsel %vm273_vm5, %v1490_v52, %v272_v2  ;;  %v279_v25 = vmul.f32 %v1223_v3, %v1499_v57 }
  0xe7   :  { %vm280_vm8 = vcmp.eq.f32.partialorder %v1499_v57, inf  ;;  %1240 = vrcp.f32 %v469_v4  ;;  %vm282_vm9 = vcmp.eq.f32.partialorder %v1499_v57, 0.0  ;;  %v283_v50 = vand.u32 2147483648, %v1499_v57 }
  0xe8   :  { %v384_v27 = vmul.f32 %v1225_v10, %v1494_v54  ;;  %v470_v30 = vadd.f32 1e-10, %v270_v15  ;;  %v382_v31 = vsel %vm380_vm7, %v381_v11, %v379_v20  ;;  %vm385_vm10 = vcmp.eq.f32.partialorder %v1494_v54, inf  ;;  %v1663_v62 = vpop.xlane.xlu1 %231 }
  0xe9   :  { %1242 = vrsqrt.f32 %v1545_v23  ;;  %v277_v33 = vsel %vm275_vm6, %v276_v49, %v274_v24  ;;  %vm387_vm11 = vcmp.eq.f32.partialorder %v1494_v54, 0.0  ;;  %v286_v34 = vmul.f32 %v1227_v22, %v1518_v8  ;;  %v1675_v15 = vpop.xlane.xlu0 %201 }
  0xea   :  { %v1622_v28 = vpop.eup %1228  ;;  %1244 = vrcp.f32 %v485_v16  ;;  %vm796_vm12 = vcmask 130112   ;;  %v281_v51 = vsel %vm280_vm8, %v1499_v57, %v279_v25  ;;  %v388_v37 = vand.u32 2147483648, %v1494_v54 }
  0xeb   :  { %v1231_v32 = vpop.eup %1230  ;;  %vm287_vm13 = vcmp.eq.f32.partialorder %v1518_v8, inf  ;;  %vm289_vm14 = vcmp.eq.f32.partialorder %v1518_v8, 0.0  ;;  %v486_v38 = vadd.f32 1e-10, %v382_v31  ;;  %v386_v39 = vsel %vm385_vm10, %v1494_v54, %v384_v27 }
  0xec   :  { %v1233_v36 = vpop.eup %1232  ;;  %v290_v41 = vand.u32 2147483648, %v1518_v8  ;;  %1246 = vrsqrt.f32 %v1583_v56  ;;  %v471_v43 = vadd.f32 1e-10, %v277_v33  ;;  %v391_v45 = vmul.f32 %v1231_v32, %v1508_v1 }
  0xed   :  { %v1235_v52 = vpop.eup %1234  ;;  %1248 = vrcp.f32 %v470_v30  ;;  %vm392_vm15 = vcmp.eq.f32.partialorder %v1508_v1, inf  ;;  %v284_v47 = vsel %vm282_vm9, %v283_v50, %v281_v51  ;;  %v288_v53 = vsel %vm287_vm13, %v1518_v8, %v286_v34 }
  0xee   :  { %v293_v48 = vmul.f32 %v1233_v36, %v1557_v29  ;;  %1250 = vrsqrt.f32 %v1572_v40  ;;  %v790_v59 = vrot.slane %v1622_v28, %v1515_v5  ;;  %v389_v44 = vsel %vm387_vm11, %v388_v37, %v386_v39 }
  0xef   :  { %vm294_vm0 = vcmp.eq.f32.partialorder %v1557_v29, inf  ;;  %v854_v60 = vadd.s32 4294967216, %v1496_v55  ;;  %v1237_v46 = vpop.eup %1236  ;;  %v795_v57 = vrot.slane %v1235_v52, %v1523_v12  ;;  %vm803_vm1 = vcmask 195712   ;;  %v1710_v52 = vpop.xlane.xlu0 %203 }
  0xf0   :  { %1252 = vrcp.f32 %v486_v38  ;;  %vm394_vm2 = vcmp.eq.f32.partialorder %v1508_v1, 0.0  ;;  %v395_v61 = vand.u32 2147483648, %v1508_v1  ;;  %v1239_v63 = vpop.eup %1238  ;;  %v472_v2 = vadd.f32 1e-10, %v284_v47 }
  0xf1   :  { %v291_v54 = vsel %vm289_vm14, %v290_v41, %v288_v53  ;;  %v393_v3 = vsel %vm392_vm15, %v1508_v1, %v391_v45  ;;  %v297_v4 = vand.u32 2147483648, %v1557_v29  ;;  %v1241_v10 = vpop.eup %1240  ;;  %1254 = vrcp.f32 %v471_v43 }
  0xf2   :  { %v487_v49 = vadd.f32 1e-10, %v389_v44  ;;  %v295_v11 = vsel %vm294_vm0, %v1557_v29, %v293_v48  ;;  %vm296_vm3 = vcmp.eq.f32.partialorder %v1557_v29, 0.0  ;;  %vm810_vm4 = vcmask 261312  }
  0xf3   :  { %v1243_v16 = vpop.eup %1242  ;;  %v1679_v8 = vsub.s32 %v1551_v26, %v1502_v58  ;;  %1256 = vrsqrt.f32 %v1612_v21  ;;  %v1684_v20 = vsub.s32 %v1598_v7, %v1502_v58  ;;  %v1688_v22 = vsub.s32 %v1601_v9, %v1502_v58 }
  0xf4   :  { %v1245_v24 = vpop.eup %1244  ;;  %v899_v29 = vrot.slane %v1237_v46, %v1515_v5  ;;  %v903_v25 = vrot.slane %v1239_v63, %v1523_v12  ;;  %v473_v50 = vadd.f32 1e-10, %v291_v54  ;;  %v396_v26 = vsel %vm394_vm2, %v395_v61, %v393_v3  ;;  %v1703_v12 = vpop.xlane.xlu1 %233 }
  0xf5   :  { %1258 = vrcp.f32 %v472_v2  ;;  %v298_v27 = vsel %vm296_vm3, %v297_v4, %v295_v11  ;;  %v1695_v28 = vsub.s32 %v854_v60, %v1502_v58  ;;  %v1698_v7 = vadd.s32 4294967208, %v1496_v55  ;;  %v1745_v54 = vpop.xlane.xlu0 %205 }
  0xf6   :  { %v1247_v30 = vpop.eup %1246  ;;  %v797_v9 = vsel %vm796_vm12, %v795_v57, %v790_v59  ;;  %1260 = vrcp.f32 %v487_v49  ;;  %v398_v31 = vmul.f32 %v1243_v16, %v1545_v23  ;;  %vm399_vm5 = vcmp.eq.f32.partialorder %v1545_v23, inf }
  0xf7   :  { %v1249_v1 = vpop.eup %1248  ;;  %v802_v32 = vrot.slane %v1241_v10, %v1526_v13  ;;  %v908_v33 = vrot.slane %v1245_v24, %v1526_v13  ;;  %v488_v34 = vadd.f32 1e-10, %v396_v26  ;;  %1262 = vrsqrt.f32 %v1595_v6 }
  0xf8   :  { %v1251_v36 = vpop.eup %1250  ;;  %v904_v51 = vsel %vm796_vm12, %v903_v25, %v899_v29  ;;  %1264 = vrcp.f32 %v473_v50  ;;  %v474_v37 = vadd.f32 1e-10, %v298_v27  ;;  %vm401_vm6 = vcmp.eq.f32.partialorder %v1545_v23, 0.0  ;;  %v1730_v44 = vpop.xlane.xlu1 %235 }
  0xf9   :  { %v402_v38 = vand.u32 2147483648, %v1545_v23  ;;  %v300_v39 = vmul.f32 %v1247_v30, %v1583_v56  ;;  %vm301_vm7 = vcmp.eq.f32.partialorder %v1583_v56, inf  ;;  %1266 = vrsqrt.f32 %v1645_v42 }
  0xfa   :  { %v1253_v13 = vpop.eup %1252  ;;  %v809_v41 = vrot.slane %v1249_v1, %v1529_v14  ;;  %v400_v43 = vsel %vm399_vm5, %v1545_v23, %v398_v31  ;;  %vm303_vm8 = vcmp.eq.f32.partialorder %v1583_v56, 0.0  ;;  %1268 = vrsqrt.f32 %v1632_v35 }
  0xfb   :  { %v804_v45 = vsel %vm803_vm1, %v802_v32, %v797_v9  ;;  %v909_v47 = vsel %vm803_vm1, %v908_v33, %v904_v51  ;;  %1270 = vrcp.f32 %v488_v34  ;;  %v405_v53 = vmul.f32 %v1251_v36, %v1572_v40  ;;  %v1725_v48 = vpop.eup %1254  ;;  %v1784_v33 = vpop.xlane.xlu0 %207 }
  0xfc   :  { %1272 = vrcp.f32 %v474_v37  ;;  %v304_v59 = vand.u32 2147483648, %v1583_v56  ;;  %vm406_vm9 = vcmp.eq.f32.partialorder %v1572_v40, inf  ;;  %vm408_vm10 = vcmp.eq.f32.partialorder %v1572_v40, 0.0  ;;  %v1773_v26 = vpop.xlane.xlu1 %237 }
  0xfd   :  { %v1257_v60 = vpop.eup %1256  ;;  %v913_v46 = vrot.slane %v1253_v13, %v1529_v14  ;;  %v403_v57 = vsel %vm401_vm6, %v402_v38, %v400_v43  ;;  %v302_v61 = vsel %vm301_vm7, %v1583_v56, %v300_v39  ;;  %1274 = vrsqrt.f32 %v1675_v15 }
  0xfe   :  { %v1740_v63 = vsel %vm810_vm4, %v809_v41, %v804_v45  ;;  %v409_v2 = vand.u32 2147483648, %v1572_v40  ;;  %vm308_vm11 = vcmp.eq.f32.partialorder %v1612_v21, inf  ;;  %1276 = vrsqrt.f32 %v1663_v62 }
  0xff   :  { %v1747_v14 = vpop.eup %1258  ;;  %v816_v23 = vrot.slane %v1725_v48, %v1534_v17  ;;  %v407_v3 = vsel %vm406_vm9, %v1572_v40, %v405_v53  ;;  %vm310_vm12 = vcmp.eq.f32.partialorder %v1612_v21, 0.0  ;;  %1278 = vrsqrt.f32 %v1710_v52 }
 0x100   :  { %v1754_v4 = vpop.eup %1260  ;;  %v489_v10 = vadd.f32 1e-10, %v403_v57  ;;  %v305_v49 = vsel %vm303_vm8, %v304_v59, %v302_v61  ;;  %v307_v11 = vmul.f32 %v1257_v60, %v1612_v21  ;;  %v311_v16 = vand.u32 2147483648, %v1612_v21  ;;  %v1809_v60 = vpop.xlane.xlu1 %239 }
 0x101   :  { %v1263_v24 = vpop.eup %1262  ;;  %v1761_v29 = vsel %vm810_vm4, %v913_v46, %v909_v47  ;;  %vm413_vm13 = vcmp.eq.f32.partialorder %v1595_v6, inf  ;;  %vm415_vm14 = vcmp.eq.f32.partialorder %v1595_v6, 0.0  ;;  %v416_v25 = vand.u32 2147483648, %v1595_v6 }
 0x102   :  { %v1766_v50 = vpop.eup %1264  ;;  %v410_v56 = vsel %vm408_vm10, %v409_v2, %v407_v3  ;;  %vm315_vm15 = vcmp.eq.f32.partialorder %v1645_v42, inf  ;;  %vm317_vm0 = vcmp.eq.f32.partialorder %v1645_v42, 0.0  ;;  %1280 = vrsqrt.f32 %v1703_v12 }
 0x103   :  { %v1267_v27 = vpop.eup %1266  ;;  %v823_v30 = vrot.slane %v1747_v14, %v1537_v18  ;;  %v475_v9 = vadd.f32 1e-10, %v305_v49  ;;  %v318_v31 = vand.u32 2147483648, %v1645_v42  ;;  %vm420_vm1 = vcmp.eq.f32.partialorder %v1632_v35, inf }
 0x104   :  { %v1269_v1 = vpop.eup %1268  ;;  %1282 = vrcp.f32 %v489_v10  ;;  %v309_v40 = vsel %vm308_vm11, %v1612_v21, %v307_v11  ;;  %v412_v32 = vmul.f32 %v1263_v24, %v1595_v6  ;;  %vm422_vm2 = vcmp.eq.f32.partialorder %v1632_v35, 0.0  ;;  %v1820_v10 = vpop.xlane.xlu0 %209 }
 0x105   :  { %v1786_v34 = vpop.eup %1270  ;;  %v918_v36 = vrot.slane %v1754_v4, %v1534_v17  ;;  %v490_v51 = vadd.f32 1e-10, %v410_v56  ;;  %v423_v37 = vand.u32 2147483648, %v1632_v35  ;;  %1284 = vrsqrt.f32 %v1745_v54 }
 0x106   :  { %v1792_v38 = vpop.eup %1272  ;;  %v830_v39 = vrot.slane %v1766_v50, %v1540_v19  ;;  %v314_v13 = vmul.f32 %v1267_v27, %v1645_v42  ;;  %vm322_vm3 = vcmp.eq.f32.partialorder %v1675_v15, inf  ;;  %1286 = vrsqrt.f32 %v1730_v44 }
 0x107   :  { %v1275_v41 = vpop.eup %1274  ;;  %1288 = vrcp.f32 %v475_v9  ;;  %v312_v43 = vsel %vm310_vm12, %v311_v16, %v309_v40  ;;  %v419_v45 = vmul.f32 %v1269_v1, %v1632_v35  ;;  %vm324_vm4 = vcmp.eq.f32.partialorder %v1675_v15, 0.0 }
 0x108   :  { %v1277_v47 = vpop.eup %1276  ;;  %v414_v53 = vsel %vm413_vm13, %v1595_v6, %v412_v32  ;;  %v325_v59 = vand.u32 2147483648, %v1675_v15  ;;  %vm427_vm5 = vcmp.eq.f32.partialorder %v1663_v62, inf  ;;  %vm429_vm6 = vcmp.eq.f32.partialorder %v1663_v62, 0.0 }
 0x109   :  { %v1279_v46 = vpop.eup %1278  ;;  %v923_v21 = vrot.slane %v1786_v34, %v1537_v18  ;;  %1290 = vrcp.f32 %v490_v51  ;;  %v430_v57 = vand.u32 2147483648, %v1663_v62  ;;  %vm329_vm7 = vcmp.eq.f32.partialorder %v1710_v52, inf }
 0x10a   :  { %v476_v61 = vadd.f32 1e-10, %v312_v43  ;;  %v316_v2 = vsel %vm315_vm15, %v1645_v42, %v314_v13  ;;  %v321_v3 = vmul.f32 %v1275_v41, %v1675_v15  ;;  %1292 = vrsqrt.f32 %v1784_v33  ;;  %v1847_v42 = vpop.xlane.xlu1 %241 }
 0x10b   :  { %v417_v49 = vsel %vm415_vm14, %v416_v25, %v414_v53  ;;  %v421_v11 = vsel %vm420_vm1, %v1632_v35, %v419_v45  ;;  %v426_v16 = vmul.f32 %v1277_v47, %v1663_v62  ;;  %1294 = vrsqrt.f32 %v1773_v26 }
 0x10c   :  { %v1281_v24 = vpop.eup %1280  ;;  %v837_v56 = vrot.slane %v1792_v38, %v1679_v8  ;;  %v328_v27 = vmul.f32 %v1279_v46, %v1710_v52  ;;  %vm331_vm8 = vcmp.eq.f32.partialorder %v1710_v52, 0.0  ;;  %v332_v9 = vand.u32 2147483648, %v1710_v52 }
 0x10d   :  { %v319_v6 = vsel %vm317_vm0, %v318_v31, %v316_v2  ;;  %vm434_vm9 = vcmp.eq.f32.partialorder %v1703_v12, inf  ;;  %vm436_vm10 = vcmp.eq.f32.partialorder %v1703_v12, 0.0  ;;  %1296 = vrsqrt.f32 %v1820_v10 }
 0x10e   :  { %vm817_vm11 = vcmask 326912   ;;  %v1839_v25 = vpop.eup %1282  ;;  %v491_v1 = vadd.f32 1e-10, %v417_v49  ;;  %v424_v40 = vsel %vm422_vm2, %v423_v37, %v421_v11  ;;  %v323_v32 = vsel %vm322_vm3, %v1675_v15, %v321_v3 }
 0x10f   :  { %1298 = vrsqrt.f32 %v1809_v60  ;;  %v1285_v31 = vpop.eup %1284  ;;  %v428_v51 = vsel %vm427_vm5, %v1663_v62, %v426_v16  ;;  %v433_v13 = vmul.f32 %v1281_v24, %v1703_v12  ;;  %v437_v41 = vand.u32 2147483648, %v1703_v12 }
 0x110   :  { %1300 = vrcp.f32 %v476_v61  ;;  %v1287_v35 = vpop.eup %1286  ;;  %v477_v37 = vadd.f32 1e-10, %v319_v6  ;;  %v330_v43 = vsel %vm329_vm7, %v1710_v52, %v328_v27  ;;  %vm336_vm12 = vcmp.eq.f32.partialorder %v1745_v54, inf }
 0x111   :  { %vm338_vm13 = vcmp.eq.f32.partialorder %v1745_v54, 0.0  ;;  %vm824_vm14 = vcmask 392512   ;;  %v1859_v45 = vpop.eup %1288  ;;  %v492_v47 = vadd.f32 1e-10, %v424_v40  ;;  %v326_v53 = vsel %vm324_vm4, %v325_v59, %v323_v32 }
 0x112   :  { %v339_v46 = vand.u32 2147483648, %v1745_v54  ;;  %1302 = vrsqrt.f32 %v1847_v42  ;;  %v928_v61 = vrot.slane %v1839_v25, %v1540_v19  ;;  %v431_v2 = vsel %vm429_vm6, %v430_v57, %v428_v51 }
 0x113   :  { %1304 = vrcp.f32 %v491_v1  ;;  %v335_v3 = vmul.f32 %v1285_v31, %v1745_v54  ;;  %v1870_v49 = vpop.eup %1290  ;;  %v333_v11 = vsel %vm331_vm8, %v332_v9, %v330_v43  ;;  %v435_v15 = vsel %vm434_vm9, %v1703_v12, %v433_v13 }
 0x114   :  { %v440_v59 = vmul.f32 %v1287_v35, %v1730_v44  ;;  %vm441_vm15 = vcmp.eq.f32.partialorder %v1730_v44, inf  ;;  %vm831_vm0 = vcmask 458112   ;;  %v1293_v16 = vpop.eup %1292  ;;  %1306 = vrcp.f32 %v477_v37 }
 0x115   :  { %v478_v62 = vadd.f32 1e-10, %v326_v53  ;;  %vm443_vm1 = vcmp.eq.f32.partialorder %v1730_v44, 0.0  ;;  %v444_v57 = vand.u32 2147483648, %v1730_v44  ;;  %v1295_v24 = vpop.eup %1294  ;;  %1308 = vrcp.f32 %v492_v47 }
 0x116   :  { %v493_v52 = vadd.f32 1e-10, %v431_v2  ;;  %vm343_vm2 = vcmp.eq.f32.partialorder %v1784_v33, inf  ;;  %vm345_vm3 = vcmp.eq.f32.partialorder %v1784_v33, 0.0  ;;  %v479_v27 = vadd.f32 1e-10, %v333_v11 }
 0x117   :  { %v438_v9 = vsel %vm436_vm10, %v437_v41, %v435_v15  ;;  %v337_v6 = vsel %vm336_vm12, %v1745_v54, %v335_v3  ;;  %v346_v1 = vand.u32 2147483648, %v1784_v33  ;;  %vm838_vm4 = vcmask 523712   ;;  %v1297_v40 = vpop.eup %1296 }
 0x118   :  { %v442_v32 = vsel %vm441_vm15, %v1730_v44, %v440_v59  ;;  %v342_v31 = vmul.f32 %v1293_v16, %v1784_v33  ;;  %vm448_vm5 = vcmp.eq.f32.partialorder %v1773_v26, inf  ;;  %vm450_vm6 = vcmp.eq.f32.partialorder %v1773_v26, 0.0 }
 0x119   :  { %v1299_v12 = vpop.eup %1298  ;;  %1310 = vrcp.f32 %v478_v62  ;;  %v447_v51 = vmul.f32 %v1295_v24, %v1773_v26  ;;  %v451_v13 = vand.u32 2147483648, %v1773_v26  ;;  %v818_v41 = vsel %vm817_vm11, %v816_v23, %v1740_v63 }
 0x11a   :  { %v1902_v35 = vpop.eup %1300  ;;  %1312 = vrcp.f32 %v493_v52  ;;  %v494_v37 = vadd.f32 1e-10, %v438_v9  ;;  %v340_v43 = vsel %vm338_vm13, %v339_v46, %v337_v6  ;;  %vm350_vm7 = vcmp.eq.f32.partialorder %v1820_v10, inf }
 0x11b   :  { %vm845_vm8 = vcmask 589312   ;;  %1314 = vrcp.f32 %v479_v27  ;;  %v445_v47 = vsel %vm443_vm1, %v444_v57, %v442_v32  ;;  %v349_v53 = vmul.f32 %v1297_v40, %v1820_v10 }
 0x11c   :  { %vm352_vm9 = vcmp.eq.f32.partialorder %v1820_v10, 0.0  ;;  %v1303_v23 = vpop.eup %1302  ;;  %v344_v54 = vsel %vm343_vm2, %v1784_v33, %v342_v31  ;;  %v353_v46 = vand.u32 2147483648, %v1820_v10  ;;  %v454_v2 = vmul.f32 %v1299_v12, %v1809_v60 }
 0x11d   :  { %v825_v44 = vsel %vm824_vm14, %v823_v30, %v818_v41  ;;  %v1305_v15 = vpop.eup %1304  ;;  %v480_v59 = vadd.f32 1e-10, %v340_v43  ;;  %v449_v16 = vsel %vm448_vm5, %v1773_v26, %v447_v51  ;;  %vm455_vm10 = vcmp.eq.f32.partialorder %v1809_v60, inf }
 0x11e   :  { %v919_v14 = vsel %vm817_vm11, %v918_v36, %v1761_v29  ;;  %1316 = vrcp.f32 %v494_v37  ;;  %v495_v30 = vadd.f32 1e-10, %v445_v47  ;;  %vm457_vm12 = vcmp.eq.f32.partialorder %v1809_v60, 0.0  ;;  %v1307_v9 = vpop.eup %1306 }
 0x11f   :  { %v458_v24 = vand.u32 2147483648, %v1809_v60  ;;  %v347_v6 = vsel %vm345_vm3, %v346_v1, %v344_v54  ;;  %v351_v40 = vsel %vm350_vm7, %v1820_v10, %v349_v53  ;;  %v461_v17 = vmul.f32 %v1303_v23, %v1847_v42  ;;  %v1309_v29 = vpop.eup %1308 }
 0x120   :  { %v832_v4 = vsel %vm831_vm0, %v830_v39, %v825_v44  ;;  %v452_v36 = vsel %vm450_vm6, %v451_v13, %v449_v16  ;;  %v456_v33 = vsel %vm455_vm10, %v1809_v60, %v454_v2  ;;  %vm462_vm11 = vcmp.eq.f32.partialorder %v1847_v42, inf }
 0x121   :  { %v924_v1 = vsel %vm824_vm14, %v923_v21, %v919_v14  ;;  %v933_v50 = vrot.slane %v1870_v49, %v1679_v8  ;;  %1318 = vrcp.f32 %v480_v59  ;;  %vm464_vm13 = vcmp.eq.f32.partialorder %v1847_v42, 0.0 }
 0x122   :  { %v844_v26 = vrot.slane %v1859_v45, %v1684_v20  ;;  %v481_v39 = vadd.f32 1e-10, %v347_v6  ;;  %v354_v32 = vsel %vm352_vm9, %v353_v46, %v351_v40  ;;  %v465_v31 = vand.u32 2147483648, %v1847_v42 }
 0x123   :  { %v839_v18 = vsel %vm838_vm4, %v837_v56, %v832_v4  ;;  %v1311_v34 = vpop.eup %1310  ;;  %v496_v21 = vadd.f32 1e-10, %v452_v36  ;;  %v459_v49 = vsel %vm457_vm12, %v458_v24, %v456_v33  ;;  %v463_v12 = vsel %vm462_vm11, %v1847_v42, %v461_v17 }
 0x124   :  { %v929_v10 = vsel %vm831_vm0, %v928_v61, %v924_v1  ;;  %v1313_v45 = vpop.eup %1312  ;;  %1320 = vrcp.f32 %v495_v30  ;;  %v851_v51 = vrot.slane %v1902_v35, %v1688_v22  ;;  %v864_v8 = vsub.s32 %v1698_v7, %v1502_v58 }
 0x125   :  { %v868_v38 = vadd.s32 4294967200, %v1496_v55  ;;  %v1315_v56 = vpop.eup %1314  ;;  %v482_v60 = vadd.f32 1e-10, %v354_v32  ;;  %v846_v13 = vsel %vm845_vm8, %v844_v26, %v839_v18  ;;  %vm852_vm14 = vcmask 654912  }
 0x126   :  { %v938_v41 = vrot.slane %v1305_v15, %v1684_v20  ;;  %1322 = vrcp.f32 %v481_v39  ;;  %v497_v19 = vadd.f32 1e-10, %v459_v49  ;;  %v466_v25 = vsel %vm464_vm13, %v465_v31, %v463_v12 }
 0x127   :  { %v934_v61 = vsel %vm838_vm4, %v933_v50, %v929_v10  ;;  %1324 = vrcp.f32 %v496_v21  ;;  %v858_v35 = vrot.slane %v1307_v9, %v1695_v28  ;;  %v853_v37 = vsel %vm852_vm14, %v851_v51, %v846_v13 }
 0x128   :  { %v1317_v7 = vpop.eup %1316  ;;  %vm859_vm15 = vcmask 720512   ;;  %v875_v43 = vadd.s32 4294967192, %v1496_v55  ;;  %v943_v47 = vrot.slane %v1309_v29, %v1688_v22  ;;  %1326 = vrcp.f32 %v482_v60 }
 0x129   :  { %v498_v20 = vadd.f32 1e-10, %v466_v25  ;;  %v871_v53 = vsub.s32 %v868_v38, %v1502_v58  ;;  %v939_v42 = vsel %vm845_vm8, %v938_v41, %v934_v61  ;;  %1328 = vrcp.f32 %v497_v19 }
 0x12a   :  { %v865_v23 = vrot.slane %v1311_v34, %v864_v8  ;;  %v860_v46 = vsel %vm859_vm15, %v858_v35, %v853_v37  ;;  %vm866_vm0 = vcmask 786112   ;;  %v882_v2 = vadd.s32 4294967184, %v1496_v55 }
 0x12b   :  { %v1319_v54 = vpop.eup %1318  ;;  %v948_v44 = vrot.slane %v1313_v45, %v1695_v28  ;;  %v944_v22 = vsel %vm852_vm14, %v943_v47, %v939_v42  ;;  %1330 = vrcp.f32 %v498_v20  ;;  %vm873_vm1 = vcmask 851712  }
 0x12c   :  { %v867_v59 = vsel %vm866_vm0, %v865_v23, %v860_v46  ;;  %v889_v16 = vadd.s32 4294967176, %v1496_v55  ;;  %vm880_vm2 = vcmask 917312   ;;  %vm887_vm3 = vcmask 982912  }
 0x12d   :  { %v949_v14 = vsel %vm859_vm15, %v948_v44, %v944_v22  ;;  %vm894_vm4 = vcmask 1048512   ;;  %vm78_vm5 = vcmask 58368   ;;  %vm975_vm6 = vcmask 1041409  }
 0x12e   :  { %v1321_v15 = vpop.eup %1320  ;;  %v892_v9 = vsub.s32 %v889_v16, %v1502_v58  ;;  %79 = vst.msk [vmem:[#allocation2] sm:$0x3] %vm78_vm5, %v1414_v0  ;;  %80 = vst.msk [vmem:[#allocation3] sm:$0x3] %vm78_vm5, %v1414_v0 }
 0x130   :  { %v1323_v30 = vpop.eup %1322 }
 0x131   :  { %v1325_v28 = vpop.eup %1324 }
 0x132   :  { %v1327_v40 = vpop.eup %1326 }
 0x133   :  { %v1329_v4 = vpop.eup %1328  ;;  %v893_v33 = vrot.slane %v1327_v40, %v892_v9 }
 0x135   :  { %v1331_v1 = vpop.eup %1330  ;;  %v1008_v47 = vld [vmem:[#allocation2] sm:$0x3]  ;;  %v1028_v46 = vld [vmem:[#allocation3] sm:$0x3] }
 0x136   :  { %v973_v18 = vrot.slane %v1331_v1, %v892_v9 }
 0x13b   :  { %v1911_v48 = vpop.f32.mrb[0].mxu0 }
 0x13c   :  { %v1913_v63 = vpop.f32.mrb[0].mxu1  ;;  %v1132_v3 = vpop.f32.mrb[1].mxu0 }
 0x13d   :  { %v1152_v11 = vpop.f32.mrb[1].mxu1  ;;  %v648_v62 = vpop.f32.mrb[2].mxu0  ;;  %v878_v3 = vsub.s32 %v875_v43, %v1502_v58 }
 0x13e   :  { %v736_v57 = vpop.f32.mrb[2].mxu1  ;;  %v1133_v52 = vpop.f32.mrb[3].mxu0  ;;  %v872_v11 = vrot.slane %v1315_v56, %v871_v53  ;;  %v953_v62 = vrot.slane %v1317_v7, %v864_v8 }
 0x13f   :  { %v1153_v27 = vpop.f32.mrb[3].mxu1  ;;  %v885_v57 = vsub.s32 %v882_v2, %v1502_v58  ;;  %v879_v24 = vrot.slane %v1319_v54, %v878_v3  ;;  %v963_v29 = vrot.slane %v1325_v28, %v878_v3 }
 0x140   :  { %v874_v52 = vsel %vm873_vm1, %v872_v11, %v867_v59  ;;  %v958_v27 = vrot.slane %v1321_v15, %v871_v53  ;;  %v954_v6 = vsel %vm866_vm0, %v953_v62, %v949_v14 }
 0x141   :  { %v886_v17 = vrot.slane %v1323_v30, %v885_v57  ;;  %v881_v55 = vsel %vm880_vm2, %v879_v24, %v874_v52  ;;  %v968_v26 = vrot.slane %v1329_v4, %v885_v57 }
 0x142   :  { %v959_v36 = vsel %vm873_vm1, %v958_v27, %v954_v6 }
 0x143   :  { %v888_v50 = vsel %vm887_vm3, %v886_v17, %v881_v55  ;;  %v964_v32 = vsel %vm880_vm2, %v963_v29, %v959_v36 }
 0x144   :  { %v895_v31 = vsel %vm894_vm4, %v893_v33, %v888_v50  ;;  %v969_v21 = vsel %vm887_vm3, %v968_v26, %v964_v32 }
 0x145   :  { %v974_v45 = vsel %vm894_vm4, %v973_v18, %v969_v21 }
 0x15c   :  { %v744_v39 = vpop.permute.xlu0 %743 }
 0x15d   :  { %v751_v58 = vmul.f32 %v744_v39, %v1911_v48 }
 0x15f   :  { %v996_v34 = vmul.f32 %v895_v31, %v751_v58 }
 0x160   :  { %v749_v49 = vpop.permute.xlu1 %748 }
 0x161   :  { %v1090_v12 = vadd.f32 -1.0, %v996_v34  ;;  %v752_v10 = vmul.f32 %v749_v49, %v1913_v63 }
 0x163   :  { %v1000_v51 = vmul.f32 %v1090_v12, %v1090_v12  ;;  %v997_v8 = vmul.f32 %v974_v45, %v752_v10 }
 0x165   :  { %v1002_v38 = vmul.f32 -500000.0, %v1000_v51  ;;  %v1091_v56 = vadd.f32 -1.0, %v997_v8 }
 0x167   :  { %v1004_v60 = vmul.f32 1.442695, %v1002_v38  ;;  %v1001_v13 = vmul.f32 %v1091_v56, %v1091_v56 }
 0x169   :  { %1332 = vpow2.f32 %v1004_v60  ;;  %v1003_v41 = vmul.f32 -500000.0, %v1001_v13 }
 0x16b   :  { %v1006_v19 = vmul.f32 1.442695, %v1003_v41 }
 0x16d   :  { %1334 = vpow2.f32 %v1006_v19 }
 0x173   :  { %v1333_v48 = vpop.eup %1332 }
 0x174   :  { %1009 = vadd.xlane.f32.xlu1 %v1333_v48  ;;  %v1029_v25 = vmul.f32 %v1333_v48, %v1333_v48 }
 0x177   :  { %v1335_v61 = vpop.eup %1334 }
 0x178   :  { %1011 = vadd.xlane.f32.xlu0 %v1335_v61  ;;  %1031 = vadd.xlane.f32.xlu1 %v1029_v25  ;;  %v1030_v35 = vmul.f32 %v1335_v61, %v1335_v61 }
 0x17c   :  { %1033 = vadd.xlane.f32.xlu1 %v1030_v35 }
 0x201   :  { %v1010_v63 = vpop.xlane.xlu1 %1009 }
 0x202   :  { %v1018_v43 = vrot.slane %v1010_v63, %v1515_v5 }
 0x205   :  { %v1032_v7 = vpop.xlane.xlu1 %1031  ;;  %v1012_v37 = vpop.xlane.xlu0 %1011 }
 0x206   :  { %v1022_v20 = vrot.slane %v1012_v37, %v1515_v5  ;;  %v1040_v54 = vrot.slane %v1032_v7, %v1515_v5 }
 0x208   :  { %v1023_v53 = vsel %vm975_vm6, %v1022_v20, %v1018_v43 }
 0x209   :  { %v1025_v42 = vadd.f32 %v1023_v53, %v1008_v47  ;;  %v1034_v23 = vpop.xlane.xlu1 %1033 }
 0x20a   :  { %v1044_v2 = vrot.slane %v1034_v23, %v1515_v5 }
 0x20b   :  { %1027 = vst.msk [vmem:[#allocation2] sm:$0x3] %vm78_vm5, %v1025_v42 }
 0x20c   :  { %v1045_v0 = vsel %vm975_vm6, %v1044_v2, %v1040_v54 }
 0x20d   :  { %v1047_v44 = vadd.f32 %v1045_v0, %v1028_v46 }
 0x20f   :  { %1048 = vst.msk [vmem:[#allocation3] sm:$0x3] %vm78_vm5, %v1047_v44 }
 0x212   :  { %v1053_v3 = vld [vmem:[#allocation2] sm:$0x3] }
 0x213   :  { %v1054_v22 = vadd.f32 1e-10, %v1053_v3 }
 0x215   :  { %1336 = vrcp.f32 %v1054_v22 }
 0x216   :  { %v1052_v15 = vld [vmem:[#allocation3] sm:$0x3] }
 0x21f   :  { %v1337_v11 = vpop.eup %1336 }
 0x220   :  { %v1056_v59 = vmul.f32 %v1337_v11, %v1052_v15 }
 0x222   :  { %1057 = vst.msk [vmem:[#allocation10] sm:$0x3] %vm78_vm5, %v1056_v59 }
 0x223   :  { %1393 = shalt.err (!%p1390_p6)
}
 0x224   :  { %s1394_s10 = scalar_lea.hbm %s2032_s2, 32 }
 0x225   :  { %p1395_p7 = scmp.ne.s32.totalorder %s2032_s2, %s1394_s10  ;;  %p1398_p8 = scmp.lt.u32.totalorder %s1394_s10, %s2032_s2 }
 0x227   :  { %p1400_p9 = pnand %p1398_p8, %p1395_p7 }
 0x229   :  { %1403 = shalt.err (!%p1400_p9)
}
 0x22a   :  { %1067 = dma.vmem_to_hbm [thread:$0]  %s1065_s6, 32, %s2032_s2, [#allocation7]  }
 0x22b   :  { %1408 = dma.done.wait [#allocation7], 32  }
 0x22c   :  { %1409 = vsyncadd [#allocation7], 4294967264 }
 0x22d   :  { %1071 = vsyncpa [#allocation6], 1 }
 0x22e   :  { %1072 = vsyncpa [#allocation9], 1 }
 0x22f   :  { %1073 = vsyncpa [#allocation7], 1 }

</bundles_post_ra>
